<compile_context>
chip_gen: v7x
topology: tpu7x:2x2x1
jax: 0.10.0
libtpu: 0.0.40
codegen_flags: <defaults>
</compile_context>

<pallas_src>
import functools
import math

import jax
import jax.numpy as jnp
import numpy as np
from jax.experimental import pallas as pl
from jax.experimental.pallas import tpu as pltpu

D_EMBED = 32
N_HEADS = 4
D_MODEL = D_EMBED * N_HEADS   # 128 -> lane-dense intermediates
BATCH = 2
SEQ_Q = 8
SEQ_K = 8
NEG_INF = -1000000000.0       # exact masked_fill constant used by the module


def mha_kernel(q_ref, k_ref, v_ref, mask_ref,
               wqkv_ref, bqkv_ref, wo_ref, bo_ref,
               out_ref, *, num_heads, d_head):
    # Batch dim is squeezed by the BlockSpecs:
    #   q_ref (Sq, D), k_ref/v_ref (Sk, D), mask_ref (Sq, Sk), out_ref (Sq, D)
    keep = mask_ref[...] != 0.0                               # (Sq, Sk) bool

    def proj(x, idx):
        return (jnp.dot(x, wqkv_ref[idx], preferred_element_type=jnp.float32)
                + bqkv_ref[idx])                              # (S, d_model)

    q = proj(q_ref[...], 0)                                   # (Sq, 128)
    k = proj(k_ref[...], 1)                                   # (Sk, 128)
    v = proj(v_ref[...], 2)                                   # (Sk, 128)

    scale = 1.0 / math.sqrt(d_head)
    head_outs = []
    for h in range(num_heads):                                # static unroll (4 heads)
        lo = h * d_head
        q_h = q[:, lo:lo + d_head]                            # (Sq, d_head)
        k_h = k[:, lo:lo + d_head]                            # (Sk, d_head)
        v_h = v[:, lo:lo + d_head]                            # (Sk, d_head)
        # contract d_head on both operands (== q_h @ k_h^T, no explicit transpose)
        s = jnp.einsum('qd,kd->qk', q_h, k_h,
                       preferred_element_type=jnp.float32) * scale
        s = jnp.where(keep, s, NEG_INF)                       # masked_fill(mask==0, -1e9)
        s = s - jnp.max(s, axis=-1, keepdims=True)            # stable softmax
        e = jnp.exp(s)
        p = e / jnp.sum(e, axis=-1, keepdims=True)
        p = jnp.where(keep, p, 0.0)                           # masked_fill(mask==0, 0)
        head_outs.append(jnp.dot(p, v_h, preferred_element_type=jnp.float32))

    ctx = jnp.concatenate(head_outs, axis=-1)                 # (Sq, d_model)
    out_ref[...] = (jnp.dot(ctx, wo_ref[...], preferred_element_type=jnp.float32)
                    + bo_ref[...]).astype(out_ref.dtype)


def mha_forward(query, key, value, mask, params, *, num_heads):
    """query (B,Sq,D), key/value (B,Sk,D), mask (B,Sq,Sk) -> (B,Sq,D)."""
    B, Sq, D = query.shape
    _, Sk, _ = key.shape
    wqkv, bqkv, wo, bo = params
    d_model = wqkv.shape[-1]
    assert d_model == num_heads * D, (d_model, num_heads, D)
    assert mask.shape == (B, Sq, Sk), mask.shape

    kernel = functools.partial(mha_kernel, num_heads=num_heads, d_head=D)

    return pl.pallas_call(
        kernel,
        out_shape=jax.ShapeDtypeStruct((B, Sq, D), jnp.float32),
        grid_spec=pltpu.PrefetchScalarGridSpec(
            num_scalar_prefetch=0,
            grid=(B,),
            in_specs=[
                pl.BlockSpec((None, Sq, D), lambda b: (b, 0, 0)),    # query
                pl.BlockSpec((None, Sk, D), lambda b: (b, 0, 0)),    # key
                pl.BlockSpec((None, Sk, D), lambda b: (b, 0, 0)),    # value
                pl.BlockSpec((None, Sq, Sk), lambda b: (b, 0, 0)),   # mask
                pl.BlockSpec(wqkv.shape, lambda b: (0, 0, 0)),       # stacked Wq/Wk/Wv
                pl.BlockSpec(bqkv.shape, lambda b: (0, 0, 0)),       # stacked biases
                pl.BlockSpec(wo.shape, lambda b: (0, 0)),            # Wout
                pl.BlockSpec(bo.shape, lambda b: (0, 0)),            # bout
            ],
            out_specs=pl.BlockSpec((None, Sq, D), lambda b: (b, 0, 0)),
        ),
        compiler_params=pltpu.CompilerParams(
            dimension_semantics=("parallel",)),   # batch elems independent (v7x: 2 TCs)
    )(query, key, value, mask, wqkv, bqkv, wo, bo)


def init_params(key):
    """nn.Linear-style init U(-1/sqrt(fan_in), 1/sqrt(fan_in)); weights are stored
    pre-transposed ((in, out)) so the kernel computes x @ W on the MXU."""
    kq, kk, kv, ko = jax.random.split(key, 4)

    def linear(k, fan_in, fan_out):
        bound = 1.0 / np.sqrt(fan_in)
        k1, k2 = jax.random.split(k)
        w = jax.random.uniform(k1, (fan_in, fan_out), jnp.float32, -bound, bound)
        b = jax.random.uniform(k2, (1, fan_out), jnp.float32, -bound, bound)
        return w, b

    wq, bq = linear(kq, D_EMBED, D_MODEL)
    wk, bk = linear(kk, D_EMBED, D_MODEL)
    wv, bv = linear(kv, D_EMBED, D_MODEL)
    wo, bo = linear(ko, D_MODEL, D_EMBED)
    wqkv = jnp.stack([wq, wk, wv])        # (3, D, d_model)
    bqkv = jnp.stack([bq, bk, bv])        # (3, 1, d_model)
    return (wqkv, bqkv, wo, bo)


def reference_forward(query, key, value, mask, params, *, num_heads):
    """Pure-JAX replica of MultiHeadAttentionLayer.forward (mask required)."""
    wqkv, bqkv, wo, bo = params
    B, Sq, D = query.shape
    q = (query @ wqkv[0] + bqkv[0]).reshape(B, Sq, num_heads, D).transpose(0, 2, 1, 3)
    k = (key   @ wqkv[1] + bqkv[1]).reshape(B, -1, num_heads, D).transpose(0, 2, 1, 3)
    v = (value @ wqkv[2] + bqkv[2]).reshape(B, -1, num_heads, D).transpose(0, 2, 1, 3)
    s = jnp.einsum('bhqd,bhkd->bhqk', q, k) / math.sqrt(D)
    keep = (mask != 0.0)[:, None, :, :]
    s = jnp.where(keep, s, NEG_INF)
    p = jax.nn.softmax(s, axis=-1)
    p = jnp.where(keep, p, 0.0)
    o = jnp.einsum('bhqk,bhkd->bhqd', p, v)
    o = o.transpose(0, 2, 1, 3).reshape(B, Sq, num_heads * D)
    return o @ wo + bo


if __name__ == "__main__":
    root = jax.random.PRNGKey(0)
    kp, kq, kk, kv = jax.random.split(root, 4)

    params = init_params(kp)

    query = jax.random.normal(kq, (BATCH, SEQ_Q, D_EMBED), jnp.float32)
    key   = jax.random.normal(kk, (BATCH, SEQ_K, D_EMBED), jnp.float32)
    value = jax.random.normal(kv, (BATCH, SEQ_K, D_EMBED), jnp.float32)

    # Padding-style mask (B, Sq, Sk): 1 where both query and key positions are valid.
    len_q = jnp.array([SEQ_Q, 6])
    len_k = jnp.array([SEQ_K, 5])
    iq = jnp.arange(SEQ_Q)
    jk = jnp.arange(SEQ_K)
    mask = ((iq[None, :, None] < len_q[:, None, None]) &
            (jk[None, None, :] < len_k[:, None, None])).astype(jnp.float32)

    out = jax.block_until_ready(
        mha_forward(query, key, value, mask, params, num_heads=N_HEADS))
    ref = jax.block_until_ready(
        reference_forward(query, key, value, mask, params, num_heads=N_HEADS))

    assert out.shape == (BATCH, SEQ_Q, D_EMBED), out.shape
    np.testing.assert_allclose(np.asarray(out), np.asarray(ref),
                               rtol=1e-4, atol=1e-4)
    print("KERNEL_OK")
</pallas_src>

<mosaic_0001>
module attributes {stable_mosaic.version = 11 : i64} {
  func.func @mha_kernel(%arg0: i32, %arg1: memref<1x8x32xf32, #tpu.memory_space<vmem>>, %arg2: memref<1x8x32xf32, #tpu.memory_space<vmem>>, %arg3: memref<1x8x32xf32, #tpu.memory_space<vmem>>, %arg4: memref<1x8x8xf32, #tpu.memory_space<vmem>>, %arg5: memref<3x32x128xf32, #tpu.memory_space<vmem>>, %arg6: memref<3x1x128xf32, #tpu.memory_space<vmem>>, %arg7: memref<128x32xf32, #tpu.memory_space<vmem>>, %arg8: memref<1x32xf32, #tpu.memory_space<vmem>>, %arg9: memref<1x8x32xf32, #tpu.memory_space<vmem>>) attributes {dimension_semantics = [#tpu.dimension_semantics<parallel>], iteration_bounds = array<i64: 2>, scalar_prefetch = 0 : i64, scratch_operands = 0 : i64, tpu.core_type = #tpu.core_type<tc>, window_params = [{transform_indices = @transform_0, window_bounds = array<i64: 1, 8, 32>}, {transform_indices = @transform_1, window_bounds = array<i64: 1, 8, 32>}, {transform_indices = @transform_2, window_bounds = array<i64: 1, 8, 32>}, {transform_indices = @transform_3, window_bounds = array<i64: 1, 8, 8>}, {pipeline_mode = #tpu.pipeline_mode<synchronous>, transform_indices = @transform_4, window_bounds = array<i64: 3, 32, 128>}, {pipeline_mode = #tpu.pipeline_mode<synchronous>, transform_indices = @transform_5, window_bounds = array<i64: 3, 1, 128>}, {pipeline_mode = #tpu.pipeline_mode<synchronous>, transform_indices = @transform_6, window_bounds = array<i64: 128, 32>}, {pipeline_mode = #tpu.pipeline_mode<synchronous>, transform_indices = @transform_7, window_bounds = array<i64: 1, 32>}, {transform_indices = @transform_8, window_bounds = array<i64: 1, 8, 32>}]} {
    %c0 = arith.constant 0 : index
    %c0_0 = arith.constant 0 : index
    %c0_1 = arith.constant 0 : index
    %0 = vector.load %arg4[%c0, %c0_0, %c0_1] : memref<1x8x8xf32, #tpu.memory_space<vmem>>, vector<1x8x8xf32>
    %1 = vector.shape_cast %0 : vector<1x8x8xf32> to vector<8x8xf32>
    %cst = arith.constant 0.000000e+00 : f32
    %2 = vector.broadcast %cst : f32 to vector<8x8xf32>
    %3 = arith.cmpf one, %1, %2 : vector<8x8xf32>
    %c0_2 = arith.constant 0 : index
    %c0_3 = arith.constant 0 : index
    %c0_4 = arith.constant 0 : index
    %4 = vector.load %arg1[%c0_2, %c0_3, %c0_4] : memref<1x8x32xf32, #tpu.memory_space<vmem>>, vector<1x8x32xf32>
    %5 = vector.shape_cast %4 : vector<1x8x32xf32> to vector<8x32xf32>
    %c0_5 = arith.constant 0 : index
    %c0_6 = arith.constant 0 : index
    %c0_7 = arith.constant 0 : index
    %6 = vector.load %arg5[%c0_5, %c0_6, %c0_7] : memref<3x32x128xf32, #tpu.memory_space<vmem>>, vector<1x32x128xf32>
    %7 = vector.shape_cast %6 : vector<1x32x128xf32> to vector<32x128xf32>
    %cst_8 = arith.constant dense<0.000000e+00> : vector<8x128xf32>
    %8 = tpu.matmul %5, %7, %cst_8 {dimension_numbers = #tpu.dot_dimension_numbers<[1], [0], [0], [1], [0, 0, 1, 1], [], []>} : vector<8x32xf32>, vector<32x128xf32>, vector<8x128xf32> -> vector<8x128xf32>
    %c0_9 = arith.constant 0 : index
    %c0_10 = arith.constant 0 : index
    %c0_11 = arith.constant 0 : index
    %9 = vector.load %arg6[%c0_9, %c0_10, %c0_11] : memref<3x1x128xf32, #tpu.memory_space<vmem>>, vector<1x1x128xf32>
    %10 = vector.shape_cast %9 : vector<1x1x128xf32> to vector<1x128xf32>
    %11 = vector.broadcast %10 : vector<1x128xf32> to vector<8x128xf32>
    %12 = arith.addf %8, %11 : vector<8x128xf32>
    %c0_12 = arith.constant 0 : index
    %c0_13 = arith.constant 0 : index
    %c0_14 = arith.constant 0 : index
    %13 = vector.load %arg2[%c0_12, %c0_13, %c0_14] : memref<1x8x32xf32, #tpu.memory_space<vmem>>, vector<1x8x32xf32>
    %14 = vector.shape_cast %13 : vector<1x8x32xf32> to vector<8x32xf32>
    %c1 = arith.constant 1 : index
    %c0_15 = arith.constant 0 : index
    %c0_16 = arith.constant 0 : index
    %15 = vector.load %arg5[%c1, %c0_15, %c0_16] : memref<3x32x128xf32, #tpu.memory_space<vmem>>, vector<1x32x128xf32>
    %16 = vector.shape_cast %15 : vector<1x32x128xf32> to vector<32x128xf32>
    %cst_17 = arith.constant dense<0.000000e+00> : vector<8x128xf32>
    %17 = tpu.matmul %14, %16, %cst_17 {dimension_numbers = #tpu.dot_dimension_numbers<[1], [0], [0], [1], [0, 0, 1, 1], [], []>} : vector<8x32xf32>, vector<32x128xf32>, vector<8x128xf32> -> vector<8x128xf32>
    %c1_18 = arith.constant 1 : index
    %c0_19 = arith.constant 0 : index
    %c0_20 = arith.constant 0 : index
    %18 = vector.load %arg6[%c1_18, %c0_19, %c0_20] : memref<3x1x128xf32, #tpu.memory_space<vmem>>, vector<1x1x128xf32>
    %19 = vector.shape_cast %18 : vector<1x1x128xf32> to vector<1x128xf32>
    %20 = vector.broadcast %19 : vector<1x128xf32> to vector<8x128xf32>
    %21 = arith.addf %17, %20 : vector<8x128xf32>
    %c0_21 = arith.constant 0 : index
    %c0_22 = arith.constant 0 : index
    %c0_23 = arith.constant 0 : index
    %22 = vector.load %arg3[%c0_21, %c0_22, %c0_23] : memref<1x8x32xf32, #tpu.memory_space<vmem>>, vector<1x8x32xf32>
    %23 = vector.shape_cast %22 : vector<1x8x32xf32> to vector<8x32xf32>
    %c2 = arith.constant 2 : index
    %c0_24 = arith.constant 0 : index
    %c0_25 = arith.constant 0 : index
    %24 = vector.load %arg5[%c2, %c0_24, %c0_25] : memref<3x32x128xf32, #tpu.memory_space<vmem>>, vector<1x32x128xf32>
    %25 = vector.shape_cast %24 : vector<1x32x128xf32> to vector<32x128xf32>
    %cst_26 = arith.constant dense<0.000000e+00> : vector<8x128xf32>
    %26 = tpu.matmul %23, %25, %cst_26 {dimension_numbers = #tpu.dot_dimension_numbers<[1], [0], [0], [1], [0, 0, 1, 1], [], []>} : vector<8x32xf32>, vector<32x128xf32>, vector<8x128xf32> -> vector<8x128xf32>
    %c2_27 = arith.constant 2 : index
    %c0_28 = arith.constant 0 : index
    %c0_29 = arith.constant 0 : index
    %27 = vector.load %arg6[%c2_27, %c0_28, %c0_29] : memref<3x1x128xf32, #tpu.memory_space<vmem>>, vector<1x1x128xf32>
    %28 = vector.shape_cast %27 : vector<1x1x128xf32> to vector<1x128xf32>
    %29 = vector.broadcast %28 : vector<1x128xf32> to vector<8x128xf32>
    %30 = arith.addf %26, %29 : vector<8x128xf32>
    %31 = vector.extract_strided_slice %12 {offsets = [0, 0], sizes = [8, 32], strides = [1, 1]} : vector<8x128xf32> to vector<8x32xf32>
    %32 = vector.extract_strided_slice %21 {offsets = [0, 0], sizes = [8, 32], strides = [1, 1]} : vector<8x128xf32> to vector<8x32xf32>
    %33 = vector.extract_strided_slice %30 {offsets = [0, 0], sizes = [8, 32], strides = [1, 1]} : vector<8x128xf32> to vector<8x32xf32>
    "tpu.trace_start"() <{level = 10 : i32, message = "qd,kd->qk"}> : () -> ()
    %cst_30 = arith.constant dense<0.000000e+00> : vector<8x8xf32>
    %34 = tpu.matmul %31, %32, %cst_30 {dimension_numbers = #tpu.dot_dimension_numbers<[1], [1], [0], [0], [0, 0, 1, 0], [], []>} : vector<8x32xf32>, vector<8x32xf32>, vector<8x8xf32> -> vector<8x8xf32>
    "tpu.trace_stop"() : () -> ()
    %cst_31 = arith.constant 0.176776692 : f32
    %35 = vector.broadcast %cst_31 : f32 to vector<8x8xf32>
    %36 = arith.mulf %34, %35 : vector<8x8xf32>
    %cst_32 = arith.constant -1.000000e+09 : f32
    %37 = vector.broadcast %cst_32 : f32 to vector<8x8xf32>
    %38 = arith.select %3, %36, %37 : vector<8x8xi1>, vector<8x8xf32>
    %cst_33 = arith.constant dense<0xFF800000> : vector<8xf32>
    %39 = vector.multi_reduction <maximumf>, %38, %cst_33 [1] : vector<8x8xf32> to vector<8xf32>
    %40 = vector.shape_cast %39 : vector<8xf32> to vector<8x1xf32>
    %41 = vector.broadcast %40 : vector<8x1xf32> to vector<8x8xf32>
    %42 = arith.subf %38, %41 : vector<8x8xf32>
    %43 = math.exp %42 : vector<8x8xf32>
    %cst_34 = arith.constant dense<0.000000e+00> : vector<8xf32>
    %44 = vector.multi_reduction <add>, %43, %cst_34 [1] : vector<8x8xf32> to vector<8xf32>
    %45 = vector.shape_cast %44 : vector<8xf32> to vector<8x1xf32>
    %46 = vector.broadcast %45 : vector<8x1xf32> to vector<8x8xf32>
    %47 = arith.divf %43, %46 : vector<8x8xf32>
    %cst_35 = arith.constant 0.000000e+00 : f32
    %48 = vector.broadcast %cst_35 : f32 to vector<8x8xf32>
    %49 = arith.select %3, %47, %48 : vector<8x8xi1>, vector<8x8xf32>
    %cst_36 = arith.constant dense<0.000000e+00> : vector<8x32xf32>
    %50 = tpu.matmul %49, %33, %cst_36 {dimension_numbers = #tpu.dot_dimension_numbers<[1], [0], [0], [1], [0, 0, 1, 1], [], []>} : vector<8x8xf32>, vector<8x32xf32>, vector<8x32xf32> -> vector<8x32xf32>
    %51 = vector.extract_strided_slice %12 {offsets = [0, 32], sizes = [8, 32], strides = [1, 1]} : vector<8x128xf32> to vector<8x32xf32>
    %52 = vector.extract_strided_slice %21 {offsets = [0, 32], sizes = [8, 32], strides = [1, 1]} : vector<8x128xf32> to vector<8x32xf32>
    %53 = vector.extract_strided_slice %30 {offsets = [0, 32], sizes = [8, 32], strides = [1, 1]} : vector<8x128xf32> to vector<8x32xf32>
    "tpu.trace_start"() <{level = 10 : i32, message = "qd,kd->qk"}> : () -> ()
    %cst_37 = arith.constant dense<0.000000e+00> : vector<8x8xf32>
    %54 = tpu.matmul %51, %52, %cst_37 {dimension_numbers = #tpu.dot_dimension_numbers<[1], [1], [0], [0], [0, 0, 1, 0], [], []>} : vector<8x32xf32>, vector<8x32xf32>, vector<8x8xf32> -> vector<8x8xf32>
    "tpu.trace_stop"() : () -> ()
    %cst_38 = arith.constant 0.176776692 : f32
    %55 = vector.broadcast %cst_38 : f32 to vector<8x8xf32>
    %56 = arith.mulf %54, %55 : vector<8x8xf32>
    %cst_39 = arith.constant -1.000000e+09 : f32
    %57 = vector.broadcast %cst_39 : f32 to vector<8x8xf32>
    %58 = arith.select %3, %56, %57 : vector<8x8xi1>, vector<8x8xf32>
    %cst_40 = arith.constant dense<0xFF800000> : vector<8xf32>
    %59 = vector.multi_reduction <maximumf>, %58, %cst_40 [1] : vector<8x8xf32> to vector<8xf32>
    %60 = vector.shape_cast %59 : vector<8xf32> to vector<8x1xf32>
    %61 = vector.broadcast %60 : vector<8x1xf32> to vector<8x8xf32>
    %62 = arith.subf %58, %61 : vector<8x8xf32>
    %63 = math.exp %62 : vector<8x8xf32>
    %cst_41 = arith.constant dense<0.000000e+00> : vector<8xf32>
    %64 = vector.multi_reduction <add>, %63, %cst_41 [1] : vector<8x8xf32> to vector<8xf32>
    %65 = vector.shape_cast %64 : vector<8xf32> to vector<8x1xf32>
    %66 = vector.broadcast %65 : vector<8x1xf32> to vector<8x8xf32>
    %67 = arith.divf %63, %66 : vector<8x8xf32>
    %cst_42 = arith.constant 0.000000e+00 : f32
    %68 = vector.broadcast %cst_42 : f32 to vector<8x8xf32>
    %69 = arith.select %3, %67, %68 : vector<8x8xi1>, vector<8x8xf32>
    %cst_43 = arith.constant dense<0.000000e+00> : vector<8x32xf32>
    %70 = tpu.matmul %69, %53, %cst_43 {dimension_numbers = #tpu.dot_dimension_numbers<[1], [0], [0], [1], [0, 0, 1, 1], [], []>} : vector<8x8xf32>, vector<8x32xf32>, vector<8x32xf32> -> vector<8x32xf32>
    %71 = vector.extract_strided_slice %12 {offsets = [0, 64], sizes = [8, 32], strides = [1, 1]} : vector<8x128xf32> to vector<8x32xf32>
    %72 = vector.extract_strided_slice %21 {offsets = [0, 64], sizes = [8, 32], strides = [1, 1]} : vector<8x128xf32> to vector<8x32xf32>
    %73 = vector.extract_strided_slice %30 {offsets = [0, 64], sizes = [8, 32], strides = [1, 1]} : vector<8x128xf32> to vector<8x32xf32>
    "tpu.trace_start"() <{level = 10 : i32, message = "qd,kd->qk"}> : () -> ()
    %cst_44 = arith.constant dense<0.000000e+00> : vector<8x8xf32>
    %74 = tpu.matmul %71, %72, %cst_44 {dimension_numbers = #tpu.dot_dimension_numbers<[1], [1], [0], [0], [0, 0, 1, 0], [], []>} : vector<8x32xf32>, vector<8x32xf32>, vector<8x8xf32> -> vector<8x8xf32>
    "tpu.trace_stop"() : () -> ()
    %cst_45 = arith.constant 0.176776692 : f32
    %75 = vector.broadcast %cst_45 : f32 to vector<8x8xf32>
    %76 = arith.mulf %74, %75 : vector<8x8xf32>
    %cst_46 = arith.constant -1.000000e+09 : f32
    %77 = vector.broadcast %cst_46 : f32 to vector<8x8xf32>
    %78 = arith.select %3, %76, %77 : vector<8x8xi1>, vector<8x8xf32>
    %cst_47 = arith.constant dense<0xFF800000> : vector<8xf32>
    %79 = vector.multi_reduction <maximumf>, %78, %cst_47 [1] : vector<8x8xf32> to vector<8xf32>
    %80 = vector.shape_cast %79 : vector<8xf32> to vector<8x1xf32>
    %81 = vector.broadcast %80 : vector<8x1xf32> to vector<8x8xf32>
    %82 = arith.subf %78, %81 : vector<8x8xf32>
    %83 = math.exp %82 : vector<8x8xf32>
    %cst_48 = arith.constant dense<0.000000e+00> : vector<8xf32>
    %84 = vector.multi_reduction <add>, %83, %cst_48 [1] : vector<8x8xf32> to vector<8xf32>
    %85 = vector.shape_cast %84 : vector<8xf32> to vector<8x1xf32>
    %86 = vector.broadcast %85 : vector<8x1xf32> to vector<8x8xf32>
    %87 = arith.divf %83, %86 : vector<8x8xf32>
    %cst_49 = arith.constant 0.000000e+00 : f32
    %88 = vector.broadcast %cst_49 : f32 to vector<8x8xf32>
    %89 = arith.select %3, %87, %88 : vector<8x8xi1>, vector<8x8xf32>
    %cst_50 = arith.constant dense<0.000000e+00> : vector<8x32xf32>
    %90 = tpu.matmul %89, %73, %cst_50 {dimension_numbers = #tpu.dot_dimension_numbers<[1], [0], [0], [1], [0, 0, 1, 1], [], []>} : vector<8x8xf32>, vector<8x32xf32>, vector<8x32xf32> -> vector<8x32xf32>
    %91 = vector.extract_strided_slice %12 {offsets = [0, 96], sizes = [8, 32], strides = [1, 1]} : vector<8x128xf32> to vector<8x32xf32>
    %92 = vector.extract_strided_slice %21 {offsets = [0, 96], sizes = [8, 32], strides = [1, 1]} : vector<8x128xf32> to vector<8x32xf32>
    %93 = vector.extract_strided_slice %30 {offsets = [0, 96], sizes = [8, 32], strides = [1, 1]} : vector<8x128xf32> to vector<8x32xf32>
    "tpu.trace_start"() <{level = 10 : i32, message = "qd,kd->qk"}> : () -> ()
    %cst_51 = arith.constant dense<0.000000e+00> : vector<8x8xf32>
    %94 = tpu.matmul %91, %92, %cst_51 {dimension_numbers = #tpu.dot_dimension_numbers<[1], [1], [0], [0], [0, 0, 1, 0], [], []>} : vector<8x32xf32>, vector<8x32xf32>, vector<8x8xf32> -> vector<8x8xf32>
    "tpu.trace_stop"() : () -> ()
    %cst_52 = arith.constant 0.176776692 : f32
    %95 = vector.broadcast %cst_52 : f32 to vector<8x8xf32>
    %96 = arith.mulf %94, %95 : vector<8x8xf32>
    %cst_53 = arith.constant -1.000000e+09 : f32
    %97 = vector.broadcast %cst_53 : f32 to vector<8x8xf32>
    %98 = arith.select %3, %96, %97 : vector<8x8xi1>, vector<8x8xf32>
    %cst_54 = arith.constant dense<0xFF800000> : vector<8xf32>
    %99 = vector.multi_reduction <maximumf>, %98, %cst_54 [1] : vector<8x8xf32> to vector<8xf32>
    %100 = vector.shape_cast %99 : vector<8xf32> to vector<8x1xf32>
    %101 = vector.broadcast %100 : vector<8x1xf32> to vector<8x8xf32>
    %102 = arith.subf %98, %101 : vector<8x8xf32>
    %103 = math.exp %102 : vector<8x8xf32>
    %cst_55 = arith.constant dense<0.000000e+00> : vector<8xf32>
    %104 = vector.multi_reduction <add>, %103, %cst_55 [1] : vector<8x8xf32> to vector<8xf32>
    %105 = vector.shape_cast %104 : vector<8xf32> to vector<8x1xf32>
    %106 = vector.broadcast %105 : vector<8x1xf32> to vector<8x8xf32>
    %107 = arith.divf %103, %106 : vector<8x8xf32>
    %cst_56 = arith.constant 0.000000e+00 : f32
    %108 = vector.broadcast %cst_56 : f32 to vector<8x8xf32>
    %109 = arith.select %3, %107, %108 : vector<8x8xi1>, vector<8x8xf32>
    %cst_57 = arith.constant dense<0.000000e+00> : vector<8x32xf32>
    %110 = tpu.matmul %109, %93, %cst_57 {dimension_numbers = #tpu.dot_dimension_numbers<[1], [0], [0], [1], [0, 0, 1, 1], [], []>} : vector<8x8xf32>, vector<8x32xf32>, vector<8x32xf32> -> vector<8x32xf32>
    %111 = tpu.concatenate %50, %70, %90, %110 in 1 : vector<8x32xf32>, vector<8x32xf32>, vector<8x32xf32>, vector<8x32xf32> -> vector<8x128xf32>
    %c0_58 = arith.constant 0 : index
    %c0_59 = arith.constant 0 : index
    %112 = vector.load %arg7[%c0_58, %c0_59] : memref<128x32xf32, #tpu.memory_space<vmem>>, vector<128x32xf32>
    %cst_60 = arith.constant dense<0.000000e+00> : vector<8x32xf32>
    %113 = tpu.matmul %111, %112, %cst_60 {dimension_numbers = #tpu.dot_dimension_numbers<[1], [0], [0], [1], [0, 0, 1, 1], [], []>} : vector<8x128xf32>, vector<128x32xf32>, vector<8x32xf32> -> vector<8x32xf32>
    %c0_61 = arith.constant 0 : index
    %c0_62 = arith.constant 0 : index
    %114 = vector.load %arg8[%c0_61, %c0_62] : memref<1x32xf32, #tpu.memory_space<vmem>>, vector<1x32xf32>
    %115 = vector.broadcast %114 : vector<1x32xf32> to vector<8x32xf32>
    %116 = arith.addf %113, %115 : vector<8x32xf32>
    %c0_63 = arith.constant 0 : index
    %c0_64 = arith.constant 0 : index
    %c0_65 = arith.constant 0 : index
    %117 = vector.load %arg9[%c0_63, %c0_64, %c0_65] : memref<1x8x32xf32, #tpu.memory_space<vmem>>, vector<1x8x32xf32>
    %118 = vector.shape_cast %117 : vector<1x8x32xf32> to vector<8x32xf32>
    %119 = vector.shape_cast %116 : vector<8x32xf32> to vector<1x8x32xf32>
    tpu.vector_store %arg9[%c0_63, %c0_64, %c0_65], %119 {strides = array<i32>} : memref<1x8x32xf32, #tpu.memory_space<vmem>>, vector<1x8x32xf32>,
    return
  }
  func.func @transform_0(%arg0: i32) -> (i32, i32, i32) {
    %c0_i32 = arith.constant 0 : i32
    %c0_i32_0 = arith.constant 0 : i32
    %c0_i32_1 = arith.constant 0 : i32
    return %arg0, %c0_i32, %c0_i32_0 : i32, i32, i32
  }
  func.func @transform_1(%arg0: i32) -> (i32, i32, i32) {
    %c0_i32 = arith.constant 0 : i32
    %c0_i32_0 = arith.constant 0 : i32
    %c0_i32_1 = arith.constant 0 : i32
    return %arg0, %c0_i32, %c0_i32_0 : i32, i32, i32
  }
  func.func @transform_2(%arg0: i32) -> (i32, i32, i32) {
    %c0_i32 = arith.constant 0 : i32
    %c0_i32_0 = arith.constant 0 : i32
    %c0_i32_1 = arith.constant 0 : i32
    return %arg0, %c0_i32, %c0_i32_0 : i32, i32, i32
  }
  func.func @transform_3(%arg0: i32) -> (i32, i32, i32) {
    %c0_i32 = arith.constant 0 : i32
    %c0_i32_0 = arith.constant 0 : i32
    %c0_i32_1 = arith.constant 0 : i32
    return %arg0, %c0_i32, %c0_i32_0 : i32, i32, i32
  }
  func.func @transform_4(%arg0: i32) -> (i32, i32, i32) {
    %c0_i32 = arith.constant 0 : i32
    %c0_i32_0 = arith.constant 0 : i32
    %c0_i32_1 = arith.constant 0 : i32
    %c0_i32_2 = arith.constant 0 : i32
    return %c0_i32, %c0_i32_0, %c0_i32_1 : i32, i32, i32
  }
  func.func @transform_5(%arg0: i32) -> (i32, i32, i32) {
    %c0_i32 = arith.constant 0 : i32
    %c0_i32_0 = arith.constant 0 : i32
    %c0_i32_1 = arith.constant 0 : i32
    %c0_i32_2 = arith.constant 0 : i32
    return %c0_i32, %c0_i32_0, %c0_i32_1 : i32, i32, i32
  }
  func.func @transform_6(%arg0: i32) -> (i32, i32) {
    %c0_i32 = arith.constant 0 : i32
    %c0_i32_0 = arith.constant 0 : i32
    %c0_i32_1 = arith.constant 0 : i32
    return %c0_i32, %c0_i32_0 : i32, i32
  }
  func.func @transform_7(%arg0: i32) -> (i32, i32) {
    %c0_i32 = arith.constant 0 : i32
    %c0_i32_0 = arith.constant 0 : i32
    %c0_i32_1 = arith.constant 0 : i32
    return %c0_i32, %c0_i32_0 : i32, i32
  }
  func.func @transform_8(%arg0: i32) -> (i32, i32, i32) {
    %c0_i32 = arith.constant 0 : i32
    %c0_i32_0 = arith.constant 0 : i32
    %c0_i32_1 = arith.constant 0 : i32
    return %arg0, %c0_i32, %c0_i32_0 : i32, i32, i32
  }
}

</mosaic_0001>

<bundles_post_ra>
// kernel: tpu_custom_call.1
= control target key start
LH: loop header
LB: loop body
LE: loop exit
PB: predicated region body
PF: predicated region fallthrough
CT: control target
= control target key end

     0   :  { %13 = vsyncpa [#allocation3], 0  ;;  %s2239_s0 = inlined_call_operand.vmem [shape: f32[2,8,32], index: 0, kind: input, shape index: {}]   ;;  %s2240_s1 = inlined_call_operand.vmem [shape: f32[2,8,32], index: 1, kind: input, shape index: {}]   ;;  %s2241_s2 = inlined_call_operand.vmem [shape: f32[2,8,32], index: 2, kind: input, shape index: {}]   ;;  %s2242_s3 = inlined_call_operand.vmem [shape: f32[2,8,8], index: 3, kind: input, shape index: {}]   ;;  %s2243_s4 = inlined_call_operand.vmem [shape: f32[3,32,128], index: 4, kind: input, shape index: {}]   ;;  %s2244_s5 = inlined_call_operand.vmem [shape: f32[3,1,128], index: 5, kind: input, shape index: {}]   ;;  %s2245_s6 = inlined_call_operand.vmem [shape: f32[128,32], index: 6, kind: input, shape index: {}]   ;;  %s2246_s7 = inlined_call_operand.vmem [shape: f32[1,32], index: 7, kind: input, shape index: {}]   ;;  %s2247_s8 = inlined_call_operand.hbm [shape: f32[2,8,32], index: 8, kind: output, shape index: {}]  }
   0x1   :  { %15 = vsyncpa [#allocation3 + $0x1], 0  ;;  %s1920_s27 = smov 0   ;;  %s1922_s28 = smov 0  }
   0x2   :  { %s1924_s29 = smov 0   ;;  %s1926_s30 = smov 0  }
   0x3 LB: > { %s1941_s9 = sadd.s32 4294967295, %s1866_s30   ;;  %s1503_s10 = sadd.s32 4294967294, %s1866_s30   ;;  %s1866_s30 = sphi %s1926_s30, %s2253_s30   ;;  %s1862_s29 = sphi %s1924_s29, %s2252_s29   ;;  %s1858_s28 = sphi %s1922_s28, %s2251_s28   ;;  %s1854_s27 = sphi %s1920_s27, %s2250_s27  }
   0x4   : > { %s1945_s11 = sadd.s32 1, %s1866_s30   ;;  %s216_s12 = sadd.s32 1, %s1862_s29 }
   0x5   : > { %s213_s13 = ssub.s32 %s1866_s30, %s1945_s11  ;;  %p226_p0 = scmp.ne.s32.totalorder %s1862_s29, %s1858_s28 }
   0x6   : > { %p214_p1 = scmp.eq.s32.totalorder %s213_s13, 0  ;;  %p227_p2 = scmp.eq.s32.totalorder %s1941_s9, 1 }
   0x7   : > { %p232_p3 = scmp.ne.s32.totalorder %s1858_s28, %s1854_s27  ;;  %p233_p4 = scmp.eq.s32.totalorder %s1503_s10, 1 }
   0x8   : > { %s1956_s14 = scalar_select %p214_p1, %s1862_s29, %s216_s12  }
   0x9   : > { %p1958_p5 = por %p227_p2, %p226_p0  ;;  %p1962_p6 = por %p233_p4, %p232_p3 }
   0xa   : > { %p1506_p7 = scmp.ge.s32.totalorder %s1866_s30, 1  ;;  %p291_p8 = scmp.lt.s32.totalorder %s1866_s30, 3 }
   0xc   : > { %p292_p9 = pnand %p1506_p7, %p291_p8 }
   0xd   : > { %v355_v0 = vld [vmem:[%s2243_s4] sm:$0xff] (!%p292_p9)  ;;  %v356_v1 = vld [vmem:[%s2243_s4 + $0x8] sm:$0xff] (!%p292_p9)  ;;  %v357_v2 = vld [vmem:[%s2243_s4 + $0x10] sm:$0xff] (!%p292_p9)  ;;  %v1868_v3 = vmov (!%p292_p9), 0.0|0.0   ;;  %vm1869_vm0 = vmmov (!%p292_p9), 0   ;;  %v1870_v6 = vmov (!%p292_p9), 0.0  }
   0xe   : > { %295 = sbr.rel (%p292_p9) target bundleno = 1462 (0x5b6), region = 52  ;;  %1701 = vmatprep.subr.bf16.mxu1 (!%p292_p9), %v1868_v3  ;;  %v1702_v4 = vpack.c.bf16 (!%p292_p9), %v356_v1, %v355_v0  ;;  %v358_v5 = vld [vmem:[%s2243_s4 + $0x18] sm:$0xff] (!%p292_p9)  ;;  %1601 = vmatprep.mubr.msk.f32.mxu1 (!%p292_p9), %vm1869_vm0, %v1870_v6  ;;  %p336_p10 = scmp.lt.s32.totalorder (!%p292_p9), %s1941_s9, 1  ;;  %v1514_v8 = vld [vmem:[%s2243_s4 + $0x20] sm:$0xff] (!%p292_p9)  ;;  %v1515_v9 = vld [vmem:[%s2243_s4 + $0x28] sm:$0xff] (!%p292_p9)  ;;  %vm366_vm1 = vcmask (!%p292_p9), 261120  }
   0xf   : > { %1636 = vmatprep.subr.mxu0 (!%p292_p9), %v1870_v6  ;;  %1638 = vmatprep.mubr.msk.f32.mxu0 (!%p292_p9), %vm1869_vm0, %v1870_v6  ;;  %v1705_v7 = vpack.c.bf16 (!%p292_p9), %v358_v5, %v357_v2  ;;  %v1708_v11 = vpack.c.bf16 (!%p292_p9), %v1515_v9, %v1514_v8  ;;  %v1516_v12 = vld [vmem:[%s2243_s4 + $0x30] sm:$0xff] (!%p292_p9)  ;;  %v1517_v13 = vld [vmem:[%s2243_s4 + $0x38] sm:$0xff] (!%p292_p9)  ;;  %v1521_v15 = vld [vmem:[%s2243_s4 + $0x40] sm:$0xff] (!%p292_p9)  ;;  %s1871_s19 = smov (!%p292_p9), 64   ;;  %s1873_s21 = smov (!%p292_p9), 32   ;;  %vm692_vm3 = vcmask (!%p292_p9), 64512  }
  0x10   : > { %1703 = vmatpush3.bf16.msra.mxu1 (!%p292_p9), %v1702_v4  ;;  %v1711_v14 = vpack.c.bf16 (!%p292_p9), %v1517_v13, %v1516_v12  ;;  %v1522_v16 = vld [vmem:[%s2243_s4 + $0x48] sm:$0xff] (!%p292_p9)  ;;  %v1523_v19 = vld [vmem:[%s2243_s4 + $0x50] sm:$0xff] (!%p292_p9)  ;;  %v1524_v20 = vld [vmem:[%s2243_s4 + $0x58] sm:$0xff] (!%p292_p9)  ;;  %vm1296_vm4 = vcmask (!%p292_p9), 523264   ;;  %vm1298_vm5 = vcmask (!%p292_p9), 785408   ;;  %s1542_s18 = sshll.u32 (!%p292_p9), %s1941_s9, 7 }
  0x11   : > { %1704 = vmatprep.subr.bf16.mxu1 (!%p292_p9), %v1868_v3  ;;  %v1714_v18 = vpack.c.bf16 (!%p292_p9), %v1522_v16, %v1521_v15  ;;  %v1717_v21 = vpack.c.bf16 (!%p292_p9), %v1524_v20, %v1523_v19  ;;  %v1519_v25 = vld [vmem:[%s2244_s5 + $0x1] ss:$0 sm:$0xff] (!%p292_p9)  ;;  %v1512_v29 = vld [vmem:[%s2244_s5] ss:$0 sm:$0xff] (!%p292_p9)  ;;  %v1526_v31 = vld [vmem:[%s2244_s5 + $0x2] ss:$0 sm:$0xff] (!%p292_p9) }
  0x14   : > { %1706 = vmatpush3.bf16.msra.mxu1 (!%p292_p9), %v1705_v7 }
  0x15   : > { %s337_s25 = scalar_select %p336_p10, %s1941_s9, 1  ;;  %1707 = vmatprep.subr.bf16.mxu1 %v1868_v3 }
  0x16   : > { %s1874_s9 = smov [#allocation2]  }
  0x17   : > { %s1995_s17 = sshll.u32 %s337_s25, 3  ;;  %s2196_s25 = scalar_lea.hbm %s2247_s8, %s1542_s18 }
  0x18   : > { %s339_s20 = scalar_lea.vmem %s2239_s0, %s1995_s17  ;;  %s343_s10 = scalar_lea.vmem %s2240_s1, %s1995_s17 }
  0x19   : > { %v354_v10 = vld [vmem:[%s339_s20] sm:$0xff]  ;;  %s347_s26 = scalar_lea.vmem %s2241_s2, %s1995_s17  ;;  %s1872_s20 = smov 96  }
  0x1a   : > { %1602 = vmatmul.mubr.msk.f32.vlgmr.msra.gmra.mrb[0].mxu1 %vm366_vm1, %v354_v10  ;;  %v440_v17 = vld [vmem:[%s343_s10] sm:$0xff]  ;;  %s1808_s10 = sshll.u32 %s1874_s9, 4  ;;  %s1809_s10 = int_to_ptr.vmem [resolvable:$false] %s1808_s10 }
  0x1b   : > { %1709 = vmatpush3.bf16.msra.mxu1 %v1708_v11  ;;  %1612 = vmatprep.mubr.msk.f32.mxu1 %vm1869_vm0, %v1870_v6  ;;  %v527_v22 = vld [vmem:[%s347_s26] sm:$0xff]  ;;  %s351_s26 = scalar_lea.vmem %s2242_s3, %s1995_s17 }
  0x1c   : > { %1710 = vmatprep.subr.bf16.mxu1 %v1868_v3  ;;  %v2084_v41 = vld [vmem:[%s351_s26] sm:$0xff] }
  0x1d   : > { %vm353_vm2 = vcmp.ne.f32.partialorder %v2084_v41, 0.0 }
  0x1f   : > { %1712 = vmatpush3.bf16.msra.mxu1 %v1711_v14 }
  0x20   : > { %1713 = vmatprep.subr.bf16.mxu1 %v1868_v3 }
  0x22   : > { %1613 = vmatmul.mubr.msk.f32.vlgmr.msra.gmra.mrb[2].mxu1 %vm366_vm1, %v440_v17 }
  0x23   : > { %1715 = vmatpush3.bf16.msra.mxu1 %v1714_v18  ;;  %1623 = vmatprep.mubr.msk.f32.mxu1 %vm1869_vm0, %v1870_v6 }
  0x24   : > { %1716 = vmatprep.subr.bf16.mxu1 %v1868_v3 }
  0x27   : > { %1718 = vmatpush3.bf16.msra.mxu1 %v1717_v21 }
  0x28   : > { %1626 = vmatprep.subr.mxu1 %v1870_v6 }
  0x2a   : > { %1624 = vmatmul.mubr.msk.f32.vlgmr.msra.gmra.mrb[4].mxu1 %vm366_vm1, %v527_v22 }
  0x2b   : > { %1628 = vmatprep.mubr.msk.f32.mxu1 %vm1869_vm0, %v1870_v6 }
  0xed   : > { %v436_v23 = vpop.f32.mrb[0].mxu1 }
  0xee   : > { %v1603_v24 = vpop.f32.mrb[1].mxu1  ;;  %v437_v30 = vadd.f32 %v1512_v29, %v436_v23 }
  0xf5   : > { %v523_v26 = vpop.f32.mrb[2].mxu1 }
  0xf6   : > { %v524_v27 = vadd.f32 %v1519_v25, %v523_v26  ;;  %v1614_v28 = vpop.f32.mrb[3].mxu1 }
  0xf8   : > { %949 = vrot.lane.b32.xlu1 %v524_v27, %s1871_s19  ;;  %780 = vrot.lane.b32.xlu0 %v524_v27, %s1872_s20 }
  0xf9   : > { %1627 = vmatpush3.xpose.msk.msra.mxu1 %vm366_vm1, %v524_v27 }
  0xfa   : > { %1631 = vmatprep.subr.mxu1 %v1870_v6 }
  0xfc   : > { %1629 = vmatmul.mubr.msk.f32.vlgmr.msra.gmra.mrb[6].mxu1 %vm366_vm1, %v437_v30  ;;  %947 = vrot.lane.b32.xlu1 %v437_v30, %s1871_s19 }
  0xfd   : > { %778 = vrot.lane.b32.xlu0 %v437_v30, %s1872_s20  ;;  %1633 = vmatprep.mubr.msk.f32.mxu1 %vm1869_vm0, %v1870_v6  ;;  %v610_v32 = vpop.f32.mrb[4].mxu1 }
  0xfe   : > { %v2061_v33 = vadd.f32 %v1526_v31, %v610_v32  ;;  %v1625_v34 = vpop.f32.mrb[5].mxu1 }
 0x100   : > { %1115 = vrot.lane.b32.xlu1 %v437_v30, %s1873_s21  ;;  %1632 = vmatpush3.msra.mxu1 %v2061_v33 }
 0x101   : > { %1117 = vrot.lane.b32.xlu0 %v524_v27, %s1873_s21  ;;  %1641 = vmatprep.subr.mxu1 %v1870_v6 }
 0x16a   : > { %v781_v35 = vpop.permute.xlu0 %780  ;;  %v950_v36 = vpop.permute.xlu1 %949 }
 0x16b   : > { %1637 = vmatpush3.xpose.msk.msra.mxu0 %vm366_vm1, %v781_v35 }
 0x16c   : > { %1646 = vmatprep.subr.mxu0 %v1870_v6 }
 0x16e   : > { %v948_v38 = vpop.permute.xlu1 %947 }
 0x16f   : > { %v779_v37 = vpop.permute.xlu0 %778 }
 0x170   : > { %1639 = vmatmul.mubr.msk.f32.vlgmr.msra.gmra.mrb[0].mxu0 %vm366_vm1, %v779_v37 }
 0x171   : > { %1647 = vmatpush3.xpose.msk.msra.mxu0 %vm366_vm1, %v950_v36  ;;  %1648 = vmatprep.mubr.msk.f32.mxu0 %vm1869_vm0, %v1870_v6 }
 0x172   : > { %1656 = vmatprep.subr.mxu0 %v1870_v6  ;;  %v1116_v40 = vpop.permute.xlu1 %1115 }
 0x173   : > { %v1118_v39 = vpop.permute.xlu0 %1117 }
 0x174   : > { %1649 = vmatmul.mubr.msk.f32.vlgmr.msra.gmra.mrb[2].mxu0 %vm366_vm1, %v948_v38 }
 0x175   : > { %1657 = vmatpush3.xpose.msk.msra.mxu0 %vm366_vm1, %v1118_v39  ;;  %1658 = vmatprep.mubr.msk.f32.mxu0 %vm1869_vm0, %v1870_v6  ;;  %v1300_v39 = vld [vmem:[%s2245_s6] sm:$0xff] }
 0x176   : > { %1719 = vmatprep.subr.bf16.mxu0 %v1868_v3 }
 0x178   : > { %1659 = vmatmul.mubr.msk.f32.vlgmr.msra.gmra.mrb[4].mxu0 %vm366_vm1, %v1116_v40  ;;  %v1301_v40 = vld [vmem:[%s2245_s6 + $0x8] sm:$0xff] }
 0x179   : > { %1698 = vmatprep.mubr.msk.f32.mxu0 %vm1869_vm0, %v1870_v6 }
 0x1cf   : > { %v686_v42 = vpop.f32.mrb[6].mxu1 }
 0x1d0   : > { %v690_v43 = vmul.f32 0.17677669, %v686_v42  ;;  %v1630_v44 = vpop.f32.mrb[7].mxu1  ;;  %v1302_v42 = vld [vmem:[%s2245_s6 + $0x10] sm:$0xff] }
 0x1d1   : > { %v1304_v44 = vld [vmem:[%s2245_s6 + $0x20] sm:$0xff] }
 0x1d2   : > { %v691_v45 = vsel %vm353_vm2, %v690_v43, -1e+09  ;;  %v1720_v43 = vpack.c.bf16 %v1301_v40, %v1300_v39 }
 0x1d3   : > { %v693_v46 = vsel %vm692_vm3, %v691_v45, -inf }
 0x1d4   : > { %694 = vmax.xlane.f32.xlu0 %v693_v46  ;;  %1721 = vmatpush3.bf16.msra.mxu0 %v1720_v43 }
 0x1d5   : > { %1722 = vmatprep.subr.bf16.mxu0 %v1868_v3 }
 0x243   : > { %v852_v47 = vpop.f32.mrb[0].mxu0 }
 0x244   : > { %v856_v48 = vmul.f32 0.17677669, %v852_v47  ;;  %v1640_v49 = vpop.f32.mrb[1].mxu0  ;;  %v1306_v47 = vld [vmem:[%s2245_s6 + $0x30] sm:$0xff] }
 0x246   : > { %v857_v50 = vsel %vm353_vm2, %v856_v48, -1e+09  ;;  %v1307_v48 = vld [vmem:[%s2245_s6 + $0x38] sm:$0xff] }
 0x247   : > { %v1021_v51 = vpop.f32.mrb[2].mxu0  ;;  %v858_v52 = vsel %vm692_vm3, %v857_v50, -inf  ;;  %v1729_v49 = vpack.c.bf16 %v1307_v48, %v1306_v47 }
 0x248   : > { %v1025_v53 = vmul.f32 0.17677669, %v1021_v51  ;;  %859 = vmax.xlane.f32.xlu1 %v858_v52  ;;  %v1650_v54 = vpop.f32.mrb[3].mxu0  ;;  %v1309_v51 = vld [vmem:[%s2245_s6 + $0x48] sm:$0xff] }
 0x24a   : > { %v1026_v55 = vsel %vm353_vm2, %v1025_v53, -1e+09 }
 0x24b   : > { %v1189_v56 = vpop.f32.mrb[4].mxu0  ;;  %v1027_v57 = vsel %vm692_vm3, %v1026_v55, -inf }
 0x24c   : > { %v1193_v58 = vmul.f32 0.17677669, %v1189_v56  ;;  %v1660_v59 = vpop.f32.mrb[5].mxu0  ;;  %1028 = vmax.xlane.f32.xlu0 %v1027_v57  ;;  %v1311_v56 = vld [vmem:[%s2245_s6 + $0x58] sm:$0xff] }
 0x24d   : > { %v1313_v59 = vld [vmem:[%s2245_s6 + $0x68] sm:$0xff] }
 0x24e   : > { %v1194_v60 = vsel %vm353_vm2, %v1193_v58, -1e+09  ;;  %v1312_v58 = vld [vmem:[%s2245_s6 + $0x60] sm:$0xff] }
 0x24f   : > { %v1195_v61 = vsel %vm692_vm3, %v1194_v60, -inf }
 0x250   : > { %1196 = vmax.xlane.f32.xlu0 %v1195_v61  ;;  %v1314_v61 = vld [vmem:[%s2245_s6 + $0x70] sm:$0xff] }
 0x259   : > { %871 = vrot.lane.b32.xlu1 %v2061_v33, %s1872_s20 }
 0x261   : > { %v695_v62 = vpop.xlane.xlu0 %694 }
 0x262   : > { %v696_v63 = vsub.f32 %v691_v45, %v695_v62  ;;  %v1305_v45 = vld [vmem:[%s2245_s6 + $0x28] sm:$0xff]  ;;  %v1315_v62 = vld [vmem:[%s2245_s6 + $0x78] sm:$0xff] }
 0x263   : > { %v1726_v46 = vpack.c.bf16 %v1305_v45, %v1304_v44 }
 0x264   : > { %v697_v0 = vmul.f32 1.442695, %v696_v63  ;;  %v1741_v63 = vpack.c.bf16 %v1315_v62, %v1314_v61 }
 0x266   : > { %1788 = vpow2.f32 %v697_v0 }
 0x270   : > { %v1789_v1 = vpop.eup %1788 }
 0x271   : > { %v699_v2 = vsel %vm692_vm3, %v1789_v1, 0.0 }
 0x27d   : > { %700 = vadd.xlane.f32.xlu1 %v699_v2 }
 0x2d5   : > { %v860_v4 = vpop.xlane.xlu1 %859 }
 0x2d6   : > { %v861_v5 = vsub.f32 %v857_v50, %v860_v4  ;;  %v1308_v50 = vld [vmem:[%s2245_s6 + $0x40] sm:$0xff] }
 0x2d7   : > { %v1732_v54 = vpack.c.bf16 %v1309_v51, %v1308_v50 }
 0x2d8   : > { %v862_v7 = vmul.f32 1.442695, %v861_v5 }
 0x2d9   : > { %v1029_v8 = vpop.xlane.xlu0 %1028  ;;  %v872_v20 = vpop.permute.xlu1 %871 }
 0x2da   : > { %1790 = vpow2.f32 %v862_v7  ;;  %v1030_v9 = vsub.f32 %v1026_v55, %v1029_v8  ;;  %v1310_v55 = vld [vmem:[%s2245_s6 + $0x50] sm:$0xff] }
 0x2db   : > { %v1735_v57 = vpack.c.bf16 %v1311_v56, %v1310_v55 }
 0x2dc   : > { %v1031_v10 = vmul.f32 1.442695, %v1030_v9 }
 0x2dd   : > { %v1197_v11 = vpop.xlane.xlu0 %1196 }
 0x2de   : > { %1792 = vpow2.f32 %v1031_v10  ;;  %v1198_v12 = vsub.f32 %v1194_v60, %v1197_v11  ;;  %v1738_v60 = vpack.c.bf16 %v1313_v59, %v1312_v58 }
 0x2e0   : > { %v1199_v13 = vmul.f32 1.442695, %v1198_v12 }
 0x2e2   : > { %1794 = vpow2.f32 %v1199_v13  ;;  %v1540_v13 = vld [vmem:[%s2246_s7] ss:$0 sm:$0xff] }
 0x2e4   : > { %v1791_v14 = vpop.eup %1790 }
 0x2e5   : > { %v864_v15 = vsel %vm692_vm3, %v1791_v14, 0.0 }
 0x2e6   : > { %865 = vadd.xlane.f32.xlu0 %v864_v15 }
 0x2e8   : > { %v1793_v16 = vpop.eup %1792 }
 0x2e9   : > { %v1033_v17 = vsel %vm692_vm3, %v1793_v16, 0.0 }
 0x2ea   : > { %1034 = vadd.xlane.f32.xlu1 %v1033_v17 }
 0x2ec   : > { %v1795_v18 = vpop.eup %1794 }
 0x2ed   : > { %v1201_v19 = vsel %vm692_vm3, %v1795_v18, 0.0 }
 0x2ee   : > { %1202 = vadd.xlane.f32.xlu0 %v1201_v19 }
 0x2fb   : > { %1207 = vrot.lane.b32.xlu1 %v2061_v33, %s1873_s21 }
 0x304   : > { %1039 = vrot.lane.b32.xlu0 %v2061_v33, %s1871_s19 }
 0x30a   : > { %v701_v21 = vpop.xlane.xlu1 %700 }
 0x30b   : > { %1796 = vrcp.f32 %v701_v21 }
 0x315   : > { %v1797_v22 = vpop.eup %1796 }
 0x316   : > { %v703_v23 = vmul.f32 %v1797_v22, %v1789_v1 }
 0x318   : > { %v704_v24 = vsel %vm353_vm2, %v703_v23, 0.0 }
 0x319   : > { %1634 = vmatmul.mubr.msk.f32.vlgmr.msra.gmra.mrb[8].mxu1 %vm692_vm3, %v704_v24 }
 0x31a   : > { %1642 = vmatpush3.msra.mxu1 %v872_v20  ;;  %1643 = vmatprep.mubr.msk.f32.mxu1 %vm1869_vm0, %v1870_v6 }
 0x31b   : > { %1651 = vmatprep.subr.mxu1 %v1870_v6 }
 0x373   : > { %v866_v25 = vpop.xlane.xlu0 %865 }
 0x374   : > { %1798 = vrcp.f32 %v866_v25 }
 0x377   : > { %v1035_v26 = vpop.xlane.xlu1 %1034 }
 0x378   : > { %1800 = vrcp.f32 %v1035_v26 }
 0x37b   : > { %v1203_v27 = vpop.xlane.xlu0 %1202  ;;  %v1208_v36 = vpop.permute.xlu1 %1207 }
 0x37c   : > { %1802 = vrcp.f32 %v1203_v27 }
 0x37e   : > { %v1799_v28 = vpop.eup %1798 }
 0x37f   : > { %v868_v29 = vmul.f32 %v1799_v28, %v1791_v14  ;;  %v1040_v32 = vpop.permute.xlu0 %1039 }
 0x381   : > { %v869_v30 = vsel %vm353_vm2, %v868_v29, 0.0 }
 0x382   : > { %v1801_v31 = vpop.eup %1800  ;;  %1644 = vmatmul.mubr.msk.f32.vlgmr.msra.gmra.mrb[10].mxu1 %vm692_vm3, %v869_v30 }
 0x383   : > { %1652 = vmatpush3.msra.mxu1 %v1040_v32  ;;  %1653 = vmatprep.mubr.msk.f32.mxu1 %vm1869_vm0, %v1870_v6  ;;  %v1037_v33 = vmul.f32 %v1801_v31, %v1793_v16 }
 0x384   : > { %1661 = vmatprep.subr.mxu1 %v1870_v6 }
 0x385   : > { %v1038_v34 = vsel %vm353_vm2, %v1037_v33, 0.0 }
 0x386   : > { %v1803_v35 = vpop.eup %1802  ;;  %1654 = vmatmul.mubr.msk.f32.vlgmr.msra.gmra.mrb[12].mxu1 %vm692_vm3, %v1038_v34 }
 0x387   : > { %1662 = vmatpush3.msra.mxu1 %v1208_v36  ;;  %1663 = vmatprep.mubr.msk.f32.mxu1 %vm1869_vm0, %v1870_v6  ;;  %v1205_v37 = vmul.f32 %v1803_v35, %v1795_v18  ;;  %v1303_v6 = vld [vmem:[%s2245_s6 + $0x18] sm:$0xff] }
 0x388   : > { %v1723_v41 = vpack.c.bf16 %v1303_v6, %v1302_v42 }
 0x389   : > { %v1206_v38 = vsel %vm353_vm2, %v1205_v37, 0.0 }
 0x38a   : > { %1664 = vmatmul.mubr.msk.f32.vlgmr.msra.gmra.mrb[14].mxu1 %vm692_vm3, %v1206_v38  ;;  %1724 = vmatpush3.bf16.msra.mxu0 %v1723_v41 }
 0x38b   : > { %1725 = vmatprep.subr.bf16.mxu0 %v1868_v3 }
 0x38e   : > { %1727 = vmatpush3.bf16.msra.mxu0 %v1726_v46 }
 0x38f   : > { %1728 = vmatprep.subr.bf16.mxu0 %v1868_v3 }
 0x392   : > { %1730 = vmatpush3.bf16.msra.mxu0 %v1729_v49 }
 0x393   : > { %1731 = vmatprep.subr.bf16.mxu0 %v1868_v3 }
 0x396   : > { %1733 = vmatpush3.bf16.msra.mxu0 %v1732_v54 }
 0x397   : > { %1734 = vmatprep.subr.bf16.mxu0 %v1868_v3 }
 0x39a   : > { %1736 = vmatpush3.bf16.msra.mxu0 %v1735_v57 }
 0x39b   : > { %1737 = vmatprep.subr.bf16.mxu0 %v1868_v3 }
 0x39e   : > { %1739 = vmatpush3.bf16.msra.mxu0 %v1738_v60 }
 0x39f   : > { %1740 = vmatprep.subr.bf16.mxu0 %v1868_v3 }
 0x3a2   : > { %1742 = vmatpush3.bf16.msra.mxu0 %v1741_v63 }
 0x3ec   : > { %v774_v52 = vpop.f32.mrb[8].mxu1 }
 0x3ed   : > { %v1635_v53 = vpop.f32.mrb[9].mxu1 }
 0x455   : > { %v943_v0 = vpop.f32.mrb[10].mxu1 }
 0x456   : > { %1284 = vrot.lane.b32.xlu1 %v943_v0, %s1873_s21  ;;  %v1645_v1 = vpop.f32.mrb[11].mxu1  ;;  %s333_s21 = sand.u32 1, %s1858_s28  }
 0x457   : > { %s1507_s12 = sshll.u32 %s333_s21, 3  ;;  %s1395_s26 = scalar_lea.sflag [#allocation3], %s333_s21 }
 0x459   : > { %v1111_v2 = vpop.f32.mrb[12].mxu1 }
 0x45a   : > { %1288 = vrot.lane.b32.xlu0 %v1111_v2, %s1871_s19  ;;  %v1655_v4 = vpop.f32.mrb[13].mxu1 }
 0x45d   : > { %v1279_v3 = vpop.f32.mrb[14].mxu1 }
 0x45e   : > { %1292 = vrot.lane.b32.xlu1 %v1279_v3, %s1872_s20  ;;  %v1665_v5 = vpop.f32.mrb[15].mxu1  ;;  %s335_s20 = scalar_lea.vmem [#allocation2], %s1507_s12  ;;  %s1810_s12 = scalar_lea.vmem %s1809_s10, 256 }
 0x45f   : > { %s1408_s22 = sshll.u32 %s335_s20, 4  ;;  %s2198_s22 = int_to_ptr.vmem [resolvable:$true] %s1408_s22 }
 0x460   : > { %s1804_s17 = scalar_lea.vmem %s2198_s22, 128  ;;  %p1811_p0 = scmp.lt.s32.totalorder %s2198_s22, %s1809_s10 }
 0x461   : > { %p1805_p11 = scmp.ne.s32.totalorder %s2198_s22, %s1804_s17  ;;  %p1812_p1 = scmp.lt.s32.totalorder %s1810_s12, %s1804_s17 }
 0x463   : > { %p1806_p12 = pnand %p1805_p11, %p1958_p5  ;;  %p1813_p2 = por %p1812_p1, %p1811_p0 }
 0x465   : > { %p1807_p13 = pneg %p1806_p12 }
 0x467   : > { %p1814_p3 = pnand %p1813_p2, %p1807_p13 }
 0x4c8   : > { %v1285_v7 = vpop.permute.xlu1 %1284 }
 0x4c9   : > { %v1295_v9 = vsel %vm366_vm1, %v774_v52, %v1285_v7 }
 0x4cc   : > { %v1289_v8 = vpop.permute.xlu0 %1288 }
 0x4cd   : > { %v1297_v10 = vsel %vm1296_vm4, %v1295_v9, %v1289_v8 }
 0x4d0   : > { %v1293_v11 = vpop.permute.xlu1 %1292 }
 0x4d1   : > { %v1299_v12 = vsel %vm1298_vm5, %v1297_v10, %v1293_v11 }
 0x4d2   : > { %1699 = vmatmul.mubr.f32.vlgmr.msra.gmra.mrb[6].mxu0 %v1299_v12 }
 0x5a5   : > { %v1389_v14 = vpop.f32.mrb[6].mxu0 }
 0x5a6   : > { %v1390_v15 = vadd.f32 %v1540_v13, %v1389_v14  ;;  %v1700_v16 = vpop.f32.mrb[7].mxu0 }
 0x5a8   : > { %1393 = vst.msk [vmem:[%s335_s20] sm:$0xff] %vm366_vm1, %v1390_v15 }
 0x5a9   : > { %1817 = shalt.err (!%p1814_p3)
}
 0x5aa   : > { %s1818_s21 = scalar_lea.hbm %s2196_s25, 128  ;;  %s1822_s18 = scalar_lea.hbm %s2247_s8, 256 }
 0x5ab   : > { %p1819_p4 = scmp.ne.s32.totalorder %s2196_s25, %s1818_s21  ;;  %p1823_p9 = scmp.lt.u32.totalorder %s2196_s25, %s2247_s8 }
 0x5ac   : > { %p1824_p10 = scmp.lt.u32.totalorder %s1822_s18, %s1818_s21  ;;  %p1826_p12 = scmp.lt.u32.totalorder %s1818_s21, %s2196_s25 }
 0x5ad   : > { %p1820_p7 = pnand %p1819_p4, %p1958_p5 }
 0x5ae   : > { %p1825_p11 = por %p1824_p10, %p1823_p9 }
 0x5af   : > { %p1821_p8 = pneg %p1820_p7 }
 0x5b0   : > { %p1827_p13 = por %p1826_p12, %p1825_p11 }
 0x5b2   : > { %p1828_p0 = pnand %p1827_p13, %p1821_p8 }
 0x5b4   : > { %1831 = shalt.err (!%p1828_p0)
}
 0x5b5   : > { %1743 = dma.vmem_to_hbm [thread:$0]  (%p1958_p5), %s2198_s22, 128, %s2196_s25, %s1395_s26  }
 0x5b6 PF: > { %p1749_p1 = scmp.ge.s32.totalorder %s1866_s30, 2  ;;  %s1420_s24 = sand.u32 1, %s1854_s27  }
 0x5b7   : > { %s1421_s17 = scalar_lea.sflag [#allocation3], %s1420_s24 }
 0x5b8   : > { %p1746_p2 = pnand %p1749_p1, %p1962_p6 }
 0x5ba   : > { %1849 = dma.done.wait (!%p1746_p2), %s1421_s17, 128  }
 0x5bb   : > { %1851 = vsyncadd (!%p1746_p2), %s1421_s17, 4294967168  ;;  %p18_p3 = scmp.ge.s32.totalorder %s1945_s11, 4   ;;  %s2250_s27 = smov %s1858_s28 }
 0x5bc   : > { %s2251_s28 = smov %s1862_s29  ;;  %s2252_s29 = smov %s1956_s14 }
 0x5bd   : > { %s2253_s30 = smov %s1945_s11  ;;  %20 = sbr.rel (!%p18_p3) target bundleno = 3 (0x3), region = 100 }
 0x5c4   :  { %1426 = vsyncpa [#allocation3], 1 }
 0x5c5   :  { %1428 = vsyncpa [#allocation3 + $0x1], 1 }

</bundles_post_ra>
